<compile_context>
chip_gen: v7x
topology: tpu7x:2x2x1
jax: 0.10.0
libtpu: 0.0.40
codegen_flags: <defaults>
</compile_context>

<pallas_src>
import jax
import jax.numpy as jnp
from jax.experimental import pallas as pl
from jax.experimental.pallas import tpu as pltpu

# ----------------------------- problem sizes --------------------------------
N_B = 2          # batch
IN_CH = 4        # config.in_channels
PATCH = 2        # config.patch_size (cubic)
HIDDEN = 64      # config.hidden_size
D_IN = H_IN = W_IN = 16
EPS = 1e-5       # LayerNormChannel default


# ============================ Pallas kernel ==================================

def _embed_kernel(p_ref, w_ref, b_ref, g_ref, beta_ref, o_ref):
    # p_ref:    (1, K, S)   im2col'd non-overlapping patches (K = Cin*P^3)
    # w_ref:    (hidden, K) flattened Conv3d weight
    # b_ref:    (hidden, 1) conv bias
    # g_ref:    (hidden, 1) LayerNormChannel weight
    # beta_ref: (hidden, 1) LayerNormChannel bias
    # o_ref:    (1, hidden, S)
    patches = p_ref[0]                                             # (K, S)

    # Patch-embedding conv == matmul.  Output wide dim (S) sits on the lanes.
    acc = (jnp.dot(w_ref[...], patches, preferred_element_type=jnp.float32)
           + b_ref[...])                                           # (hidden, S)

    # LayerNormChannel: per-voxel mean / biased variance over the channel
    # (sublane) axis, exactly matching the PyTorch module.
    mean = jnp.mean(acc, axis=0, keepdims=True)                    # (1, S)
    centered = acc - mean
    var = jnp.mean(jnp.square(centered), axis=0, keepdims=True)    # (1, S)
    xhat = centered * jax.lax.rsqrt(var + EPS)

    o_ref[0] = g_ref[...] * xhat + beta_ref[...]                   # (hidden, S)


# ============================ wrapper (glue) =================================

def embeddings_forward(x, p):
    # x: [N, Cin, D, H, W]  (NCDHW, like PyTorch)
    N, Cin, D, H, W = x.shape
    P = PATCH
    assert D % P == 0 and H % P == 0 and W % P == 0
    Dp, Hp, Wp = D // P, H // P, W // P
    S = Dp * Hp * Wp
    K = Cin * P * P * P
    hidden = p['w'].shape[0]

    # Non-overlapping patch extraction: pure reshape/transpose (no duplication).
    # K index ordering (ci, pd, ph, pw) matches torch Conv3d weight flattening.
    xr = x.reshape(N, Cin, Dp, P, Hp, P, Wp, P)
    patches = jnp.transpose(xr, (0, 1, 3, 5, 7, 2, 4, 6)).reshape(N, K, S)

    w_flat = p['w'].reshape(hidden, K)
    b = p['b'].reshape(hidden, 1)
    g = p['gamma'].reshape(hidden, 1)
    beta = p['beta'].reshape(hidden, 1)

    out = pl.pallas_call(
        _embed_kernel,
        out_shape=jax.ShapeDtypeStruct((N, hidden, S), jnp.float32),
        grid=(N,),
        in_specs=[
            pl.BlockSpec((1, K, S), lambda n: (n, 0, 0)),
            pl.BlockSpec((hidden, K), lambda n: (0, 0)),
            pl.BlockSpec((hidden, 1), lambda n: (0, 0)),
            pl.BlockSpec((hidden, 1), lambda n: (0, 0)),
            pl.BlockSpec((hidden, 1), lambda n: (0, 0)),
        ],
        out_specs=pl.BlockSpec((1, hidden, S), lambda n: (n, 0, 0)),
        compiler_params=pltpu.CompilerParams(
            dimension_semantics=("parallel",)),   # v7x: shard batch over 2 TCs
    )(patches, w_flat, b, g, beta)

    # [N, hidden, S] is already channel-major -> plain reshape back to NCDHW.
    return out.reshape(N, hidden, Dp, Hp, Wp)


# ======================= pure-JAX reference (NCDHW) ==========================

def ref_forward(x, p):
    HI = jax.lax.Precision.HIGHEST
    y = jax.lax.conv_general_dilated(
        x, p['w'], window_strides=(PATCH, PATCH, PATCH), padding='VALID',
        dimension_numbers=('NCDHW', 'OIDHW', 'NCDHW'), precision=HI)
    y = y + p['b'][None, :, None, None, None]
    u = jnp.mean(y, axis=1, keepdims=True)
    s = jnp.mean(jnp.square(y - u), axis=1, keepdims=True)
    yhat = (y - u) / jnp.sqrt(s + EPS)
    return (p['gamma'][None, :, None, None, None] * yhat
            + p['beta'][None, :, None, None, None])


# ================================ main =======================================

def make_params(key):
    kw, kb, kg, kbe = jax.random.split(key, 4)
    return {
        'w': (0.2 * jax.random.normal(kw, (HIDDEN, IN_CH, PATCH, PATCH, PATCH))
              ).astype(jnp.float32),
        'b': (0.1 * jax.random.normal(kb, (HIDDEN,))).astype(jnp.float32),
        'gamma': (1.0 + 0.1 * jax.random.normal(kg, (HIDDEN,))).astype(jnp.float32),
        'beta': (0.1 * jax.random.normal(kbe, (HIDDEN,))).astype(jnp.float32),
    }


if __name__ == "__main__":
    key = jax.random.PRNGKey(0)
    kp, kx = jax.random.split(key, 2)
    params = make_params(kp)
    x = jax.random.normal(kx, (N_B, IN_CH, D_IN, H_IN, W_IN), jnp.float32)

    out = jax.jit(embeddings_forward)(x, params)
    out = jax.block_until_ready(out)

    assert out.shape == (N_B, HIDDEN, D_IN // PATCH, H_IN // PATCH, W_IN // PATCH), out.shape
    ref = ref_forward(x, params)
    max_err = float(jnp.max(jnp.abs(out - ref)))
    if not bool(jnp.allclose(out, ref, atol=1e-2, rtol=1e-2)):
        raise AssertionError(f"mismatch vs reference, max abs err = {max_err}")
    print("KERNEL_OK")
</pallas_src>

<mosaic_0001>
module attributes {stable_mosaic.version = 11 : i64} {
  func.func @_embed_kernel(%arg0: i32, %arg1: memref<1x32x512xf32, #tpu.memory_space<vmem>>, %arg2: memref<64x32xf32, #tpu.memory_space<vmem>>, %arg3: memref<64x1xf32, #tpu.memory_space<vmem>>, %arg4: memref<64x1xf32, #tpu.memory_space<vmem>>, %arg5: memref<64x1xf32, #tpu.memory_space<vmem>>, %arg6: memref<1x64x512xf32, #tpu.memory_space<vmem>>) attributes {dimension_semantics = [#tpu.dimension_semantics<parallel>], iteration_bounds = array<i64: 2>, scalar_prefetch = 0 : i64, scratch_operands = 0 : i64, tpu.core_type = #tpu.core_type<tc>, window_params = [{transform_indices = @transform_0, window_bounds = array<i64: 1, 32, 512>}, {pipeline_mode = #tpu.pipeline_mode<synchronous>, transform_indices = @transform_1, window_bounds = array<i64: 64, 32>}, {pipeline_mode = #tpu.pipeline_mode<synchronous>, transform_indices = @transform_2, window_bounds = array<i64: 64, 1>}, {pipeline_mode = #tpu.pipeline_mode<synchronous>, transform_indices = @transform_3, window_bounds = array<i64: 64, 1>}, {pipeline_mode = #tpu.pipeline_mode<synchronous>, transform_indices = @transform_4, window_bounds = array<i64: 64, 1>}, {transform_indices = @transform_5, window_bounds = array<i64: 1, 64, 512>}]} {
    %c0 = arith.constant 0 : index
    %c0_0 = arith.constant 0 : index
    %c0_1 = arith.constant 0 : index
    %0 = vector.load %arg1[%c0, %c0_0, %c0_1] : memref<1x32x512xf32, #tpu.memory_space<vmem>>, vector<1x32x512xf32>
    %1 = vector.shape_cast %0 : vector<1x32x512xf32> to vector<32x512xf32>
    %c0_2 = arith.constant 0 : index
    %c0_3 = arith.constant 0 : index
    %2 = vector.load %arg2[%c0_2, %c0_3] : memref<64x32xf32, #tpu.memory_space<vmem>>, vector<64x32xf32>
    %cst = arith.constant dense<0.000000e+00> : vector<64x512xf32>
    %3 = tpu.matmul %2, %1, %cst {dimension_numbers = #tpu.dot_dimension_numbers<[1], [0], [0], [1], [0, 0, 1, 1], [], []>} : vector<64x32xf32>, vector<32x512xf32>, vector<64x512xf32> -> vector<64x512xf32>
    %c0_4 = arith.constant 0 : index
    %c0_5 = arith.constant 0 : index
    %4 = vector.load %arg3[%c0_4, %c0_5] : memref<64x1xf32, #tpu.memory_space<vmem>>, vector<64x1xf32>
    %5 = vector.broadcast %4 : vector<64x1xf32> to vector<64x512xf32>
    %6 = arith.addf %3, %5 : vector<64x512xf32>
    %cst_6 = arith.constant dense<0.000000e+00> : vector<512xf32>
    %7 = vector.multi_reduction <add>, %6, %cst_6 [0] : vector<64x512xf32> to vector<512xf32>
    %8 = vector.shape_cast %7 : vector<512xf32> to vector<1x512xf32>
    %cst_7 = arith.constant 6.400000e+01 : f32
    %9 = vector.broadcast %cst_7 : f32 to vector<1x512xf32>
    %10 = arith.divf %8, %9 : vector<1x512xf32>
    %11 = vector.broadcast %10 : vector<1x512xf32> to vector<64x512xf32>
    %12 = arith.subf %6, %11 : vector<64x512xf32>
    %13 = arith.mulf %12, %12 : vector<64x512xf32>
    %cst_8 = arith.constant dense<0.000000e+00> : vector<512xf32>
    %14 = vector.multi_reduction <add>, %13, %cst_8 [0] : vector<64x512xf32> to vector<512xf32>
    %15 = vector.shape_cast %14 : vector<512xf32> to vector<1x512xf32>
    %cst_9 = arith.constant 6.400000e+01 : f32
    %16 = vector.broadcast %cst_9 : f32 to vector<1x512xf32>
    %17 = arith.divf %15, %16 : vector<1x512xf32>
    %cst_10 = arith.constant 9.99999974E-6 : f32
    %18 = vector.broadcast %cst_10 : f32 to vector<1x512xf32>
    %19 = arith.addf %17, %18 : vector<1x512xf32>
    %20 = math.rsqrt %19 : vector<1x512xf32>
    %21 = vector.broadcast %20 : vector<1x512xf32> to vector<64x512xf32>
    %22 = arith.mulf %12, %21 : vector<64x512xf32>
    %c0_11 = arith.constant 0 : index
    %c0_12 = arith.constant 0 : index
    %23 = vector.load %arg4[%c0_11, %c0_12] : memref<64x1xf32, #tpu.memory_space<vmem>>, vector<64x1xf32>
    %24 = vector.broadcast %23 : vector<64x1xf32> to vector<64x512xf32>
    %25 = arith.mulf %24, %22 : vector<64x512xf32>
    %c0_13 = arith.constant 0 : index
    %c0_14 = arith.constant 0 : index
    %26 = vector.load %arg5[%c0_13, %c0_14] : memref<64x1xf32, #tpu.memory_space<vmem>>, vector<64x1xf32>
    %27 = vector.broadcast %26 : vector<64x1xf32> to vector<64x512xf32>
    %28 = arith.addf %25, %27 : vector<64x512xf32>
    %c0_15 = arith.constant 0 : index
    %c0_16 = arith.constant 0 : index
    %c0_17 = arith.constant 0 : index
    %29 = vector.load %arg6[%c0_15, %c0_16, %c0_17] : memref<1x64x512xf32, #tpu.memory_space<vmem>>, vector<1x64x512xf32>
    %30 = vector.shape_cast %29 : vector<1x64x512xf32> to vector<64x512xf32>
    %31 = vector.shape_cast %28 : vector<64x512xf32> to vector<1x64x512xf32>
    tpu.vector_store %arg6[%c0_15, %c0_16, %c0_17], %31 {strides = array<i32>} : memref<1x64x512xf32, #tpu.memory_space<vmem>>, vector<1x64x512xf32>,
    return
  }
  func.func @transform_0(%arg0: i32) -> (i32, i32, i32) {
    %c0_i32 = arith.constant 0 : i32
    %c0_i32_0 = arith.constant 0 : i32
    %c0_i32_1 = arith.constant 0 : i32
    return %arg0, %c0_i32, %c0_i32_0 : i32, i32, i32
  }
  func.func @transform_1(%arg0: i32) -> (i32, i32) {
    %c0_i32 = arith.constant 0 : i32
    %c0_i32_0 = arith.constant 0 : i32
    %c0_i32_1 = arith.constant 0 : i32
    return %c0_i32, %c0_i32_0 : i32, i32
  }
  func.func @transform_2(%arg0: i32) -> (i32, i32) {
    %c0_i32 = arith.constant 0 : i32
    %c0_i32_0 = arith.constant 0 : i32
    %c0_i32_1 = arith.constant 0 : i32
    return %c0_i32, %c0_i32_0 : i32, i32
  }
  func.func @transform_3(%arg0: i32) -> (i32, i32) {
    %c0_i32 = arith.constant 0 : i32
    %c0_i32_0 = arith.constant 0 : i32
    %c0_i32_1 = arith.constant 0 : i32
    return %c0_i32, %c0_i32_0 : i32, i32
  }
  func.func @transform_4(%arg0: i32) -> (i32, i32) {
    %c0_i32 = arith.constant 0 : i32
    %c0_i32_0 = arith.constant 0 : i32
    %c0_i32_1 = arith.constant 0 : i32
    return %c0_i32, %c0_i32_0 : i32, i32
  }
  func.func @transform_5(%arg0: i32) -> (i32, i32, i32) {
    %c0_i32 = arith.constant 0 : i32
    %c0_i32_0 = arith.constant 0 : i32
    %c0_i32_1 = arith.constant 0 : i32
    return %arg0, %c0_i32, %c0_i32_0 : i32, i32, i32
  }
}

</mosaic_0001>

<bundles_post_ra>
// kernel: embeddings_forward.1
= control target key start
LH: loop header
LB: loop body
LE: loop exit
PB: predicated region body
PF: predicated region fallthrough
CT: control target
= control target key end

     0   :  { %s1117_s18 = smov 0   ;;  %s1694_s0 = inlined_call_operand.vmem [shape: f32[2,32,512], index: 0, kind: input, shape index: {}]   ;;  %s1695_s1 = inlined_call_operand.vmem [shape: f32[64,32], index: 1, kind: input, shape index: {}]   ;;  %s1696_s2 = inlined_call_operand.vmem [shape: f32[64,1], index: 2, kind: input, shape index: {}]   ;;  %s1697_s3 = inlined_call_operand.vmem [shape: f32[64,1], index: 3, kind: input, shape index: {}]   ;;  %s1698_s4 = inlined_call_operand.vmem [shape: f32[64,1], index: 4, kind: input, shape index: {}]   ;;  %s1699_s5 = inlined_call_operand.vmem [shape: f32[2,64,512], index: 5, kind: output, shape index: {}]  }
   0x1 LB: > { %s1012_s19 = sadd.s32 4294967295, %s1083_s18   ;;  %p1016_p0 = scmp.ge.s32.totalorder %s1083_s18, 1  ;;  %s1083_s18 = sphi %s1117_s18, %s15_s18  }
   0x2   : > { %p187_p1 = scmp.lt.s32.totalorder %s1083_s18, 3 }
   0x4   : > { %p188_p2 = pnand %p1016_p0, %p187_p1 }
   0x5   : > { %p215_p3 = scmp.lt.s32.totalorder (!%p188_p2), %s1012_s19, 1  ;;  %v1085_v0 = vmov (!%p188_p2), 0.0   ;;  %v1086_v1 = vmov (!%p188_p2), 0   ;;  %v249_v2 = vld [vmem:[%s1696_s2] sm:$0xff] (!%p188_p2)  ;;  %v251_v3 = vld [vmem:[%s1696_s2 + $0x10] sm:$0xff] (!%p188_p2)  ;;  %v250_v4 = vld [vmem:[%s1696_s2 + $0x8] sm:$0xff] (!%p188_p2) }
   0x6   : > { %191 = sbr.rel (%p188_p2) target bundleno = 378 (0x17a), region = 40  ;;  %386 = vmatprep.mubr.f32.mxu0 (!%p188_p2), %v1085_v0  ;;  %499 = vmatprep.mubr.f32.mxu1 (!%p188_p2), %v1085_v0  ;;  %v252_v5 = vld [vmem:[%s1696_s2 + $0x18] sm:$0xff] (!%p188_p2)  ;;  %v253_v9 = vld [vmem:[%s1696_s2 + $0x20] sm:$0xff] (!%p188_p2)  ;;  %v254_v19 = vld [vmem:[%s1696_s2 + $0x28] sm:$0xff] (!%p188_p2)  ;;  %vm297_vm0 = vcmask (!%p188_p2), 261120  }
   0x7   : > { %1067 = vset.pattern.permute.xlu0 (!%p188_p2), %v1086_v1  ;;  %1068 = vset.pattern.permute.xlu1 (!%p188_p2), %v1086_v1  ;;  %v255_v32 = vld [vmem:[%s1696_s2 + $0x30] sm:$0xff] (!%p188_p2)  ;;  %v241_v33 = vld [vmem:[%s1695_s1] sm:$0xff] (!%p188_p2)  ;;  %v256_v34 = vld [vmem:[%s1696_s2 + $0x38] sm:$0xff] (!%p188_p2) }
   0x8   : > { %259 = vperm.xlu0 (!%p188_p2), %1067, %v249_v2   ;;  %269 = vperm.xlu1 (!%p188_p2), %1068, %v251_v3   ;;  %v765_v35 = vld [vmem:[%s1697_s3] sm:$0xff] (!%p188_p2)  ;;  %v242_v36 = vld [vmem:[%s1695_s1 + $0x8] sm:$0xff] (!%p188_p2)  ;;  %v767_v38 = vld [vmem:[%s1697_s3 + $0x10] sm:$0xff] (!%p188_p2) }
   0x9   : > { %v766_v37 = vld [vmem:[%s1697_s3 + $0x8] sm:$0xff] (!%p188_p2)  ;;  %v243_v39 = vld [vmem:[%s1695_s1 + $0x10] sm:$0xff] (!%p188_p2)  ;;  %v768_v40 = vld [vmem:[%s1697_s3 + $0x18] sm:$0xff] (!%p188_p2) }
   0xa   : > { %v769_v41 = vld [vmem:[%s1697_s3 + $0x20] sm:$0xff] (!%p188_p2)  ;;  %v244_v42 = vld [vmem:[%s1695_s1 + $0x18] sm:$0xff] (!%p188_p2)  ;;  %v770_v43 = vld [vmem:[%s1697_s3 + $0x28] sm:$0xff] (!%p188_p2) }
   0xb   : > { %v771_v44 = vld [vmem:[%s1697_s3 + $0x30] sm:$0xff] (!%p188_p2)  ;;  %v245_v45 = vld [vmem:[%s1695_s1 + $0x20] sm:$0xff] (!%p188_p2)  ;;  %v772_v46 = vld [vmem:[%s1697_s3 + $0x38] sm:$0xff] (!%p188_p2) }
   0xc   : > { %264 = vperm.xlu0 (!%p188_p2), %1067, %v250_v4   ;;  %274 = vperm.xlu1 (!%p188_p2), %1068, %v252_v5   ;;  %v845_v47 = vld [vmem:[%s1698_s4] sm:$0xff] (!%p188_p2)  ;;  %v246_v48 = vld [vmem:[%s1695_s1 + $0x28] sm:$0xff] (!%p188_p2)  ;;  %v847_v50 = vld [vmem:[%s1698_s4 + $0x10] sm:$0xff] (!%p188_p2) }
   0xd   : > { %s1701_s19 = smov (!%p215_p3, %s1012_s19), 1  ;;  %v846_v49 = vld [vmem:[%s1698_s4 + $0x8] sm:$0xff]  ;;  %v247_v51 = vld [vmem:[%s1695_s1 + $0x30] sm:$0xff]  ;;  %v848_v52 = vld [vmem:[%s1698_s4 + $0x18] sm:$0xff] }
   0xe   : > { %s1039_s24 = sshll.u32 %s1701_s19, 7  ;;  %v849_v53 = vld [vmem:[%s1698_s4 + $0x20] sm:$0xff]  ;;  %v248_v54 = vld [vmem:[%s1695_s1 + $0x38] sm:$0xff]  ;;  %v850_v55 = vld [vmem:[%s1698_s4 + $0x28] sm:$0xff]  ;;  %s1040_s17 = sshll.u32 %s1701_s19, 8 }
   0xf   : > { %s1142_s29 = scalar_lea.vmem %s1694_s0, %s1039_s24  ;;  %v851_v56 = vld [vmem:[%s1698_s4 + $0x30] sm:$0xff]  ;;  %v852_v57 = vld [vmem:[%s1698_s4 + $0x38] sm:$0xff]  ;;  %s1567_s21 = scalar_lea.vmem %s1699_s5, %s1040_s17 }
  0x10   : > { %v226_v6 = vld [vmem:[%s1142_s29 + $0x8] sm:$0xff]  ;;  %v228_v8 = vld [vmem:[%s1142_s29 + $0x18] sm:$0xff]  ;;  %v225_v12 = vld [vmem:[%s1142_s29] sm:$0xff]  ;;  %279 = vperm.xlu0 %1067, %v253_v9   ;;  %284 = vperm.xlu1 %1068, %v254_v19  }
  0x11   : > { %v230_v7 = vld [vmem:[%s1142_s29 + $0x28] sm:$0xff]  ;;  %v232_v11 = vld [vmem:[%s1142_s29 + $0x38] sm:$0xff]  ;;  %v229_v13 = vld [vmem:[%s1142_s29 + $0x20] sm:$0xff] }
  0x12   : > { %v1041_v10 = vpack.c.bf16 %v230_v7, %v226_v6  ;;  %v1049_v14 = vpack.c.bf16 %v232_v11, %v228_v8  ;;  %v1043_v15 = vpack.c.bf16 %v229_v13, %v225_v12  ;;  %v227_v16 = vld [vmem:[%s1142_s29 + $0x10] sm:$0xff]  ;;  %v234_v18 = vld [vmem:[%s1142_s29 + $0x48] sm:$0xff]  ;;  %v236_v22 = vld [vmem:[%s1142_s29 + $0x58] sm:$0xff] }
  0x13   : > { %v231_v17 = vld [vmem:[%s1142_s29 + $0x30] sm:$0xff]  ;;  %v238_v21 = vld [vmem:[%s1142_s29 + $0x68] sm:$0xff]  ;;  %v240_v23 = vld [vmem:[%s1142_s29 + $0x78] sm:$0xff] }
  0x14   : > { %1042 = vmatprep.subr.bf16.mxu0 %v1041_v10  ;;  %v1051_v20 = vpack.c.bf16 %v231_v17, %v227_v16  ;;  %1050 = vmatprep.subr.bf16.mxu1 %v1049_v14  ;;  %v1045_v24 = vpack.c.bf16 %v238_v21, %v234_v18  ;;  %v1053_v25 = vpack.c.bf16 %v240_v23, %v236_v22  ;;  %v233_v26 = vld [vmem:[%s1142_s29 + $0x40] sm:$0xff]  ;;  %v235_v28 = vld [vmem:[%s1142_s29 + $0x50] sm:$0xff] }
  0x15   : > { %1044 = vmatpush1.bf16.msra.mxu0 %v1043_v15  ;;  %v237_v27 = vld [vmem:[%s1142_s29 + $0x60] sm:$0xff]  ;;  %v239_v30 = vld [vmem:[%s1142_s29 + $0x70] sm:$0xff]  ;;  %289 = vperm.xlu0 %1067, %v255_v32  }
  0x16   : > { %1052 = vmatpush1.bf16.msra.mxu1 %v1051_v20  ;;  %v1047_v29 = vpack.c.bf16 %v237_v27, %v233_v26  ;;  %1046 = vmatprep.subr.bf16.mxu0 %v1045_v24  ;;  %v1055_v31 = vpack.c.bf16 %v239_v30, %v235_v28 }
  0x17   : > { %1054 = vmatprep.subr.bf16.mxu1 %v1053_v25  ;;  %294 = vperm.xlu1 %1068, %v256_v34  }
  0x19   : > { %1048 = vmatpush1.bf16.msra.mxu0 %v1047_v29  ;;  %775 = vperm.xlu0 %1067, %v765_v35  }
  0x1a   : > { %1056 = vmatpush1.bf16.msra.mxu1 %v1055_v31 }
  0x1b   : > { %780 = vperm.xlu1 %1068, %v766_v37  }
  0x1c   : > { %1021 = vmatmul.mubr.msk.f32.vlgmr.msra.gmra.mrb[0].mxu0 %vm297_vm0, %v241_v33 }
  0x1d   : > { %1029 = vmatmul.mubr.msk.f32.vlgmr.msra.gmra.mrb[0].mxu1 %vm297_vm0, %v241_v33  ;;  %392 = vmatprep.mubr.f32.mxu0 %v1085_v0 }
  0x1e   : > { %505 = vmatprep.mubr.f32.mxu1 %v1085_v0  ;;  %785 = vperm.xlu0 %1067, %v767_v38  }
  0x1f   : > { %790 = vperm.xlu1 %1068, %v768_v40  }
  0x20   : > { %1022 = vmatmul.mubr.msk.f32.gmra.mrb[2].mxu0 %vm297_vm0, %v242_v36 }
  0x21   : > { %1030 = vmatmul.mubr.msk.f32.gmra.mrb[2].mxu1 %vm297_vm0, %v242_v36  ;;  %398 = vmatprep.mubr.f32.mxu0 %v1085_v0 }
  0x22   : > { %511 = vmatprep.mubr.f32.mxu1 %v1085_v0  ;;  %795 = vperm.xlu0 %1067, %v769_v41  }
  0x23   : > { %800 = vperm.xlu1 %1068, %v770_v43  }
  0x24   : > { %1023 = vmatmul.mubr.msk.f32.gmra.mrb[4].mxu0 %vm297_vm0, %v243_v39 }
  0x25   : > { %1031 = vmatmul.mubr.msk.f32.gmra.mrb[4].mxu1 %vm297_vm0, %v243_v39  ;;  %404 = vmatprep.mubr.f32.mxu0 %v1085_v0 }
  0x26   : > { %517 = vmatprep.mubr.f32.mxu1 %v1085_v0  ;;  %805 = vperm.xlu0 %1067, %v771_v44  }
  0x27   : > { %810 = vperm.xlu1 %1068, %v772_v46  }
  0x28   : > { %1024 = vmatmul.mubr.msk.f32.gmra.mrb[6].mxu0 %vm297_vm0, %v244_v42 }
  0x29   : > { %1032 = vmatmul.mubr.msk.f32.gmra.mrb[6].mxu1 %vm297_vm0, %v244_v42  ;;  %410 = vmatprep.mubr.f32.mxu0 %v1085_v0 }
  0x2a   : > { %523 = vmatprep.mubr.f32.mxu1 %v1085_v0  ;;  %855 = vperm.xlu0 %1067, %v845_v47  }
  0x2b   : > { %860 = vperm.xlu1 %1068, %v846_v49  }
  0x2c   : > { %1025 = vmatmul.mubr.msk.f32.gmra.mrb[8].mxu0 %vm297_vm0, %v245_v45 }
  0x2d   : > { %1033 = vmatmul.mubr.msk.f32.gmra.mrb[8].mxu1 %vm297_vm0, %v245_v45  ;;  %416 = vmatprep.mubr.f32.mxu0 %v1085_v0 }
  0x2e   : > { %529 = vmatprep.mubr.f32.mxu1 %v1085_v0  ;;  %865 = vperm.xlu0 %1067, %v847_v50  }
  0x2f   : > { %870 = vperm.xlu1 %1068, %v848_v52  }
  0x30   : > { %1026 = vmatmul.mubr.msk.f32.gmra.mrb[10].mxu0 %vm297_vm0, %v246_v48 }
  0x31   : > { %1034 = vmatmul.mubr.msk.f32.gmra.mrb[10].mxu1 %vm297_vm0, %v246_v48  ;;  %422 = vmatprep.mubr.f32.mxu0 %v1085_v0 }
  0x32   : > { %535 = vmatprep.mubr.f32.mxu1 %v1085_v0  ;;  %875 = vperm.xlu0 %1067, %v849_v53  }
  0x33   : > { %880 = vperm.xlu1 %1068, %v850_v55  }
  0x34   : > { %1027 = vmatmul.mubr.msk.f32.gmra.mrb[12].mxu0 %vm297_vm0, %v247_v51 }
  0x35   : > { %1035 = vmatmul.mubr.msk.f32.gmra.mrb[12].mxu1 %vm297_vm0, %v247_v51  ;;  %428 = vmatprep.mubr.f32.mxu0 %v1085_v0 }
  0x36   : > { %541 = vmatprep.mubr.f32.mxu1 %v1085_v0  ;;  %885 = vperm.xlu0 %1067, %v851_v56  }
  0x37   : > { %890 = vperm.xlu1 %1068, %v852_v57  }
  0x38   : > { %1028 = vmatmul.mubr.msk.f32.gmra.mrb[14].mxu0 %vm297_vm0, %v248_v54 }
  0x39   : > { %1036 = vmatmul.mubr.msk.f32.gmra.mrb[14].mxu1 %vm297_vm0, %v248_v54 }
  0x87   : > { %v260_v58 = vpop.permute.xlu0 %259  ;;  %v270_v5 = vpop.permute.xlu1 %269 }
  0x8b   : > { %v265_v63 = vpop.permute.xlu0 %264  ;;  %v275_v26 = vpop.permute.xlu1 %274 }
  0x8f   : > { %v280_v39 = vpop.permute.xlu0 %279  ;;  %v285_v52 = vpop.permute.xlu1 %284 }
  0xef   : > { %v388_v59 = vpop.f32.mrb[0].mxu0 }
  0xf0   : > { %v501_v60 = vpop.f32.mrb[0].mxu1  ;;  %v390_v61 = vpop.f32.mrb[1].mxu0  ;;  %v1277_v1 = vadd.f32 %v388_v59, %v260_v58 }
  0xf1   : > { %v503_v62 = vpop.f32.mrb[1].mxu1  ;;  %v1281_v6 = vadd.f32 %v501_v60, %v260_v58  ;;  %v1283_v7 = vadd.f32 %v390_v61, %v260_v58 }
  0xf2   : > { %v1289_v11 = vadd.f32 %v503_v62, %v260_v58 }
  0xf3   : > { %v394_v0 = vpop.f32.mrb[2].mxu0 }
  0xf4   : > { %v1279_v2 = vadd.f32 %v394_v0, %v265_v63  ;;  %v507_v3 = vpop.f32.mrb[2].mxu1  ;;  %v396_v4 = vpop.f32.mrb[3].mxu0 }
  0xf5   : > { %v1285_v8 = vadd.f32 %v507_v3, %v265_v63  ;;  %v1287_v9 = vadd.f32 %v396_v4, %v265_v63  ;;  %v509_v10 = vpop.f32.mrb[3].mxu1  ;;  %v290_v3 = vpop.permute.xlu0 %289 }
  0xf6   : > { %v548_v12 = vadd.f32 %v1279_v2, %v1277_v1  ;;  %v1293_v13 = vadd.f32 %v509_v10, %v265_v63 }
  0xf7   : > { %v574_v14 = vadd.f32 %v1285_v8, %v1281_v6  ;;  %v561_v15 = vadd.f32 %v1287_v9, %v1283_v7  ;;  %v400_v16 = vpop.f32.mrb[4].mxu0 }
  0xf8   : > { %v587_v17 = vadd.f32 %v1293_v13, %v1289_v11  ;;  %v1301_v18 = vadd.f32 %v400_v16, %v270_v5  ;;  %v513_v19 = vpop.f32.mrb[4].mxu1  ;;  %v402_v20 = vpop.f32.mrb[5].mxu0 }
  0xf9   : > { %v1303_v21 = vadd.f32 %v513_v19, %v270_v5  ;;  %v1305_v22 = vadd.f32 %v402_v20, %v270_v5  ;;  %v515_v23 = vpop.f32.mrb[5].mxu1 }
  0xfa   : > { %v549_v24 = vadd.f32 %v548_v12, %v1301_v18  ;;  %v1308_v25 = vadd.f32 %v515_v23, %v270_v5 }
  0xfb   : > { %v575_v27 = vadd.f32 %v574_v14, %v1303_v21  ;;  %v562_v28 = vadd.f32 %v561_v15, %v1305_v22  ;;  %v406_v29 = vpop.f32.mrb[6].mxu0 }
  0xfc   : > { %v588_v30 = vadd.f32 %v587_v17, %v1308_v25  ;;  %v1313_v31 = vadd.f32 %v406_v29, %v275_v26  ;;  %v519_v32 = vpop.f32.mrb[6].mxu1  ;;  %v408_v33 = vpop.f32.mrb[7].mxu0 }
  0xfd   : > { %v1315_v34 = vadd.f32 %v519_v32, %v275_v26  ;;  %v1317_v35 = vadd.f32 %v408_v33, %v275_v26  ;;  %v521_v36 = vpop.f32.mrb[7].mxu1 }
  0xfe   : > { %v550_v37 = vadd.f32 %v549_v24, %v1313_v31  ;;  %v1320_v38 = vadd.f32 %v521_v36, %v275_v26  ;;  %v295_v26 = vpop.permute.xlu1 %294 }
  0xff   : > { %v576_v40 = vadd.f32 %v575_v27, %v1315_v34  ;;  %v563_v41 = vadd.f32 %v562_v28, %v1317_v35  ;;  %v412_v42 = vpop.f32.mrb[8].mxu0 }
 0x100   : > { %v589_v43 = vadd.f32 %v588_v30, %v1320_v38  ;;  %v1325_v44 = vadd.f32 %v412_v42, %v280_v39  ;;  %v525_v45 = vpop.f32.mrb[8].mxu1  ;;  %v414_v46 = vpop.f32.mrb[9].mxu0 }
 0x101   : > { %v1327_v47 = vadd.f32 %v525_v45, %v280_v39  ;;  %v1329_v48 = vadd.f32 %v414_v46, %v280_v39  ;;  %v527_v49 = vpop.f32.mrb[9].mxu1 }
 0x102   : > { %v551_v50 = vadd.f32 %v550_v37, %v1325_v44  ;;  %v1332_v51 = vadd.f32 %v527_v49, %v280_v39 }
 0x103   : > { %v577_v53 = vadd.f32 %v576_v40, %v1327_v47  ;;  %v564_v54 = vadd.f32 %v563_v41, %v1329_v48  ;;  %v418_v55 = vpop.f32.mrb[10].mxu0 }
 0x104   : > { %v590_v56 = vadd.f32 %v589_v43, %v1332_v51  ;;  %v1337_v57 = vadd.f32 %v418_v55, %v285_v52  ;;  %v531_v58 = vpop.f32.mrb[10].mxu1  ;;  %v420_v59 = vpop.f32.mrb[11].mxu0 }
 0x105   : > { %v1339_v60 = vadd.f32 %v531_v58, %v285_v52  ;;  %v1341_v61 = vadd.f32 %v420_v59, %v285_v52  ;;  %v533_v62 = vpop.f32.mrb[11].mxu1 }
 0x106   : > { %v552_v63 = vadd.f32 %v551_v50, %v1337_v57  ;;  %v1344_v0 = vadd.f32 %v533_v62, %v285_v52 }
 0x107   : > { %v578_v4 = vadd.f32 %v577_v53, %v1339_v60  ;;  %v565_v5 = vadd.f32 %v564_v54, %v1341_v61  ;;  %v424_v10 = vpop.f32.mrb[12].mxu0 }
 0x108   : > { %v591_v12 = vadd.f32 %v590_v56, %v1344_v0  ;;  %v425_v14 = vadd.f32 %v424_v10, %v290_v3  ;;  %v537_v15 = vpop.f32.mrb[12].mxu1  ;;  %v426_v16 = vpop.f32.mrb[13].mxu0 }
 0x109   : > { %v1349_v17 = vadd.f32 %v537_v15, %v290_v3  ;;  %v1351_v19 = vadd.f32 %v426_v16, %v290_v3  ;;  %v539_v20 = vpop.f32.mrb[13].mxu1 }
 0x10a   : > { %v553_v23 = vadd.f32 %v552_v63, %v425_v14  ;;  %v1353_v24 = vadd.f32 %v539_v20, %v290_v3 }
 0x10b   : > { %v579_v27 = vadd.f32 %v578_v4, %v1349_v17  ;;  %v566_v28 = vadd.f32 %v565_v5, %v1351_v19  ;;  %v430_v29 = vpop.f32.mrb[14].mxu0 }
 0x10c   : > { %v592_v30 = vadd.f32 %v591_v12, %v1353_v24  ;;  %v431_v32 = vadd.f32 %v430_v29, %v295_v26  ;;  %v543_v33 = vpop.f32.mrb[14].mxu1  ;;  %v432_v36 = vpop.f32.mrb[15].mxu0 }
 0x10d   : > { %v544_v37 = vadd.f32 %v543_v33, %v295_v26  ;;  %v1358_v39 = vadd.f32 %v432_v36, %v295_v26  ;;  %v545_v40 = vpop.f32.mrb[15].mxu1 }
 0x10e   : > { %v554_v41 = vadd.f32 %v553_v23, %v431_v32  ;;  %v1360_v42 = vadd.f32 %v545_v40, %v295_v26 }
 0x10f   : > { %v580_v43 = vadd.f32 %v579_v27, %v544_v37  ;;  %v567_v45 = vadd.f32 %v566_v28, %v1358_v39 }
 0x110   : > { %v555_v46 = vrot.slane %v554_v41, 4  ;;  %v593_v49 = vadd.f32 %v592_v30, %v1360_v42 }
 0x111   : > { %v581_v50 = vrot.slane %v580_v43, 4  ;;  %v568_v52 = vrot.slane %v567_v45, 4 }
 0x112   : > { %v556_v53 = vadd.f32 %v555_v46, %v554_v41  ;;  %v594_v54 = vrot.slane %v593_v49, 4 }
 0x113   : > { %v582_v55 = vadd.f32 %v581_v50, %v580_v43  ;;  %v569_v56 = vadd.f32 %v568_v52, %v567_v45 }
 0x114   : > { %v557_v58 = vrot.slane %v556_v53, 2  ;;  %v595_v63 = vadd.f32 %v594_v54, %v593_v49 }
 0x115   : > { %v583_v59 = vrot.slane %v582_v55, 2  ;;  %v570_v62 = vrot.slane %v569_v56, 2 }
 0x116   : > { %v558_v3 = vadd.f32 %v557_v58, %v556_v53  ;;  %v596_v16 = vrot.slane %v595_v63, 2  ;;  %v1423_v58 = vpop.permute.xlu1 %780 }
 0x117   : > { %v584_v4 = vadd.f32 %v583_v59, %v582_v55  ;;  %v571_v5 = vadd.f32 %v570_v62, %v569_v56 }
 0x118   : > { %v559_v10 = vrot.slane %v558_v3, 1  ;;  %v597_v29 = vadd.f32 %v596_v16, %v595_v63 }
 0x119   : > { %v585_v12 = vrot.slane %v584_v4, 1  ;;  %v572_v15 = vrot.slane %v571_v5, 1 }
 0x11a   : > { %v560_v20 = vadd.f32 %v559_v10, %v558_v3  ;;  %v598_v49 = vrot.slane %v597_v29, 1 }
 0x11b   : > { %v586_v23 = vadd.f32 %v585_v12, %v584_v4  ;;  %v573_v28 = vadd.f32 %v572_v15, %v571_v5 }
 0x11c   : > { %v601_v26 = vmul.f32 0.015625, %v560_v20 }
 0x11d   : > { %v603_v27 = vmul.f32 0.015625, %v586_v23 }
 0x11e   : > { %v1365_v30 = vsub.f32 %v1277_v1, %v601_v26  ;;  %v1368_v33 = vsub.f32 %v1279_v2, %v601_v26  ;;  %v1371_v36 = vsub.f32 %v1301_v18, %v601_v26  ;;  %v1374_v40 = vsub.f32 %v1313_v31, %v601_v26 }
 0x11f   : > { %v1377_v41 = vsub.f32 %v1325_v44, %v601_v26  ;;  %v1380_v43 = vsub.f32 %v1337_v57, %v601_v26  ;;  %v1382_v45 = vsub.f32 %v425_v14, %v601_v26  ;;  %v1384_v46 = vsub.f32 %v431_v32, %v601_v26 }
 0x120   : > { %v637_v1 = vmul.f32 %v1365_v30, %v1365_v30  ;;  %v641_v2 = vmul.f32 %v1368_v33, %v1368_v33  ;;  %v645_v18 = vmul.f32 %v1371_v36, %v1371_v36  ;;  %v649_v31 = vmul.f32 %v1374_v40, %v1374_v40 }
 0x121   : > { %v602_v44 = vmul.f32 0.015625, %v573_v28  ;;  %v1395_v14 = vsub.f32 %v1281_v6, %v603_v27  ;;  %v1398_v32 = vsub.f32 %v1285_v8, %v603_v27  ;;  %v1401_v50 = vsub.f32 %v1303_v21, %v603_v27 }
 0x122   : > { %v669_v57 = vadd.f32 %v641_v2, %v637_v1  ;;  %v1404_v52 = vsub.f32 %v1315_v34, %v603_v27  ;;  %v1407_v53 = vsub.f32 %v1327_v47, %v603_v27  ;;  %v1410_v54 = vsub.f32 %v1339_v60, %v603_v27  ;;  %v1421_v34 = vpop.permute.xlu0 %775 }
 0x123   : > { %v1413_v55 = vsub.f32 %v1349_v17, %v603_v27  ;;  %v1415_v56 = vsub.f32 %v544_v37, %v603_v27  ;;  %v639_v8 = vmul.f32 %v1395_v14, %v1395_v14  ;;  %v643_v21 = vmul.f32 %v1398_v32, %v1398_v32 }
 0x124   : > { %v670_v6 = vadd.f32 %v669_v57, %v645_v18  ;;  %v653_v47 = vmul.f32 %v1377_v41, %v1377_v41  ;;  %v657_v60 = vmul.f32 %v1380_v43, %v1380_v43  ;;  %v599_v17 = vadd.f32 %v598_v49, %v597_v29 }
 0x125   : > { %v647_v37 = vmul.f32 %v1401_v50, %v1401_v50  ;;  %v651_v62 = vmul.f32 %v1404_v52, %v1404_v52  ;;  %v695_v63 = vadd.f32 %v643_v21, %v639_v8  ;;  %v1434_v3 = vsub.f32 %v1283_v7, %v602_v44 }
 0x126   : > { %v671_v59 = vadd.f32 %v670_v6, %v649_v31  ;;  %v1437_v4 = vsub.f32 %v1287_v9, %v602_v44  ;;  %v1440_v5 = vsub.f32 %v1305_v22, %v602_v44  ;;  %v1443_v10 = vsub.f32 %v1317_v35, %v602_v44  ;;  %v1465_v27 = vpop.permute.xlu0 %785 }
 0x127   : > { %v696_v15 = vadd.f32 %v695_v63, %v647_v37  ;;  %v1446_v16 = vsub.f32 %v1329_v48, %v602_v44  ;;  %v1449_v20 = vsub.f32 %v1341_v61, %v602_v44  ;;  %v1452_v7 = vsub.f32 %v1351_v19, %v602_v44  ;;  %v1467_v19 = vpop.permute.xlu1 %790 }
 0x128   : > { %v672_v12 = vadd.f32 %v671_v59, %v653_v47  ;;  %v1455_v9 = vsub.f32 %v1358_v39, %v602_v44  ;;  %v638_v22 = vmul.f32 %v1434_v3, %v1434_v3  ;;  %v642_v35 = vmul.f32 %v1437_v4, %v1437_v4 }
 0x129   : > { %v661_v23 = vmul.f32 %v1382_v45, %v1382_v45  ;;  %v655_v61 = vmul.f32 %v1407_v53, %v1407_v53  ;;  %v697_v26 = vadd.f32 %v696_v15, %v651_v62  ;;  %v665_v39 = vmul.f32 %v1384_v46, %v1384_v46 }
 0x12a   : > { %v673_v48 = vadd.f32 %v672_v12, %v657_v60  ;;  %v659_v28 = vmul.f32 %v1410_v54, %v1410_v54  ;;  %v646_v29 = vmul.f32 %v1440_v5, %v1440_v5  ;;  %v682_v18 = vadd.f32 %v642_v35, %v638_v22 }
 0x12b   : > { %v698_v2 = vadd.f32 %v697_v26, %v655_v61  ;;  %v604_v31 = vmul.f32 0.015625, %v599_v17  ;;  %v663_v44 = vmul.f32 %v1413_v55, %v1413_v55  ;;  %v667_v49 = vmul.f32 %v1415_v56, %v1415_v56  ;;  %v1503_v35 = vpop.permute.xlu1 %800 }
 0x12c   : > { %v674_v1 = vadd.f32 %v673_v48, %v661_v23  ;;  %v650_v57 = vmul.f32 %v1443_v10, %v1443_v10  ;;  %v654_v6 = vmul.f32 %v1446_v16, %v1446_v16  ;;  %v683_v47 = vadd.f32 %v682_v18, %v646_v29 }
 0x12d   : > { %v699_v21 = vadd.f32 %v698_v2, %v659_v28  ;;  %v1484_v60 = vsub.f32 %v1289_v11, %v604_v31  ;;  %v1487_v17 = vsub.f32 %v1293_v13, %v604_v31  ;;  %v1490_v59 = vsub.f32 %v1308_v25, %v604_v31  ;;  %v1501_v11 = vpop.permute.xlu0 %795 }
 0x12e   : > { %v675_v8 = vadd.f32 %v674_v1, %v665_v39  ;;  %v1493_v37 = vsub.f32 %v1320_v38, %v604_v31  ;;  %v1496_v62 = vsub.f32 %v1332_v51, %v604_v31  ;;  %v684_v15 = vadd.f32 %v683_v47, %v650_v57 }
 0x12f   : > { %v700_v12 = vadd.f32 %v699_v21, %v663_v44  ;;  %v1499_v22 = vsub.f32 %v1344_v0, %v604_v31  ;;  %v1506_v13 = vsub.f32 %v1353_v24, %v604_v31  ;;  %v1509_v25 = vsub.f32 %v1360_v42, %v604_v31 }
 0x130   : > { %v676_v63 = vrot.slane %v675_v8, 4  ;;  %v640_v38 = vmul.f32 %v1484_v60, %v1484_v60  ;;  %v644_v51 = vmul.f32 %v1487_v17, %v1487_v17  ;;  %v658_v0 = vmul.f32 %v1449_v20, %v1449_v20 }
 0x131   : > { %v701_v48 = vadd.f32 %v700_v12, %v667_v49  ;;  %v685_v61 = vadd.f32 %v684_v15, %v654_v6  ;;  %v662_v24 = vmul.f32 %v1452_v7, %v1452_v7  ;;  %v648_v42 = vmul.f32 %v1490_v59, %v1490_v59  ;;  %v1523_v44 = vpop.permute.xlu0 %805  ;;  %v1525_v49 = vpop.permute.xlu1 %810 }
 0x132   : > { %v677_v23 = vadd.f32 %v676_v63, %v675_v8  ;;  %v708_v29 = vadd.f32 %v644_v51, %v640_v38  ;;  %v666_v18 = vmul.f32 %v1455_v9, %v1455_v9  ;;  %v652_v57 = vmul.f32 %v1493_v37, %v1493_v37 }
 0x133   : > { %v702_v39 = vrot.slane %v701_v48, 4  ;;  %v686_v28 = vadd.f32 %v685_v61, %v658_v0  ;;  %v656_v63 = vmul.f32 %v1496_v62, %v1496_v62 }
 0x134   : > { %v678_v26 = vrot.slane %v677_v23, 2  ;;  %v709_v6 = vadd.f32 %v708_v29, %v648_v42 }
 0x135   : > { %v703_v2 = vadd.f32 %v702_v39, %v701_v48  ;;  %v687_v31 = vadd.f32 %v686_v28, %v662_v24  ;;  %v1533_v39 = vpop.permute.xlu0 %855  ;;  %v1535_v24 = vpop.permute.xlu1 %860  ;;  %v664_v28 = vmul.f32 %v1506_v13, %v1506_v13 }
 0x136   : > { %v679_v1 = vadd.f32 %v678_v26, %v677_v23  ;;  %v710_v12 = vadd.f32 %v709_v6, %v652_v57  ;;  %v660_v23 = vmul.f32 %v1499_v22, %v1499_v22 }
 0x137   : > { %v704_v21 = vrot.slane %v703_v2, 2  ;;  %v688_v47 = vadd.f32 %v687_v31, %v666_v18 }
 0x138   : > { %v680_v8 = vrot.slane %v679_v1, 1  ;;  %v711_v48 = vadd.f32 %v710_v12, %v656_v63 }
 0x139   : > { %v705_v38 = vadd.f32 %v704_v21, %v703_v2  ;;  %v689_v51 = vrot.slane %v688_v47, 4  ;;  %v668_v2 = vmul.f32 %v1509_v25, %v1509_v25  ;;  %v1541_v63 = vpop.permute.xlu0 %865  ;;  %v1543_v12 = vpop.permute.xlu1 %870 }
 0x13a   : > { %v681_v15 = vadd.f32 %v680_v8, %v679_v1  ;;  %v712_v42 = vadd.f32 %v711_v48, %v660_v23 }
 0x13b   : > { %v706_v61 = vrot.slane %v705_v38, 1  ;;  %v690_v26 = vadd.f32 %v689_v51, %v688_v47 }
 0x13c   : > { %v721_v0 = vmul.f32 0.015625, %v681_v15  ;;  %v713_v31 = vadd.f32 %v712_v42, %v664_v28 }
 0x13d   : > { %v707_v18 = vadd.f32 %v706_v61, %v705_v38  ;;  %v691_v1 = vrot.slane %v690_v26, 2  ;;  %v1545_v61 = vpop.permute.xlu0 %875  ;;  %v1547_v28 = vpop.permute.xlu1 %880 }
 0x13e   : > { %v725_v29 = vadd.f32 1e-05, %v721_v0  ;;  %v714_v8 = vadd.f32 %v713_v31, %v668_v2 }
 0x13f   : > { %v723_v57 = vmul.f32 0.015625, %v707_v18  ;;  %v692_v6 = vadd.f32 %v691_v1, %v690_v26 }
 0x140   : > { %1069 = vrsqrt.f32 %v725_v29  ;;  %v715_v15 = vrot.slane %v714_v8, 4 }
 0x141   : > { %v727_v21 = vadd.f32 1e-05, %v723_v57  ;;  %v693_v47 = vrot.slane %v692_v6, 1 }
 0x142   : > { %v716_v38 = vadd.f32 %v715_v15, %v714_v8 }
 0x143   : > { %1071 = vrsqrt.f32 %v727_v21  ;;  %v694_v51 = vadd.f32 %v693_v47, %v692_v6 }
 0x144   : > { %v717_v48 = vrot.slane %v716_v38, 2 }
 0x145   : > { %v722_v23 = vmul.f32 0.015625, %v694_v51 }
 0x146   : > { %v1549_v42 = vadd.f32 %v717_v48, %v716_v38 }
 0x147   : > { %v726_v0 = vadd.f32 1e-05, %v722_v23 }
 0x149   : > { %1073 = vrsqrt.f32 %v726_v0 }
 0x14a   : > { %v1070_v26 = vpop.eup %1069 }
 0x14b   : > { %v733_v29 = vmul.f32 %v1070_v26, %v1365_v30  ;;  %v737_v18 = vmul.f32 %v1070_v26, %v1368_v33  ;;  %v741_v1 = vmul.f32 %v1070_v26, %v1371_v36  ;;  %v745_v2 = vmul.f32 %v1070_v26, %v1374_v40 }
 0x14c   : > { %v749_v31 = vmul.f32 %v1070_v26, %v1377_v41  ;;  %v753_v57 = vmul.f32 %v1070_v26, %v1380_v43  ;;  %v757_v6 = vmul.f32 %v1070_v26, %v1382_v45  ;;  %v761_v8 = vmul.f32 %v1070_v26, %v1384_v46  ;;  %v1573_v45 = vpop.permute.xlu0 %885  ;;  %v1575_v46 = vpop.permute.xlu1 %890 }
 0x14d   : > { %v813_v21 = vmul.f32 %v1421_v34, %v733_v29  ;;  %v817_v47 = vmul.f32 %v1423_v58, %v737_v18  ;;  %v821_v30 = vmul.f32 %v1465_v27, %v741_v1  ;;  %v825_v33 = vmul.f32 %v1467_v19, %v745_v2  ;;  %v1072_v15 = vpop.eup %1071 }
 0x14e   : > { %v829_v36 = vmul.f32 %v1501_v11, %v749_v31  ;;  %v833_v40 = vmul.f32 %v1503_v35, %v753_v57  ;;  %v837_v41 = vmul.f32 %v1523_v44, %v757_v6  ;;  %v841_v43 = vmul.f32 %v1525_v49, %v761_v8 }
 0x14f   : > { %v893_v51 = vadd.f32 %v1533_v39, %v813_v21  ;;  %v897_v38 = vadd.f32 %v1535_v24, %v817_v47  ;;  %v901_v23 = vadd.f32 %v1541_v63, %v821_v30  ;;  %v905_v48 = vadd.f32 %v1543_v12, %v825_v33 }
 0x150   : > { %v909_v0 = vadd.f32 %v1545_v61, %v829_v36  ;;  %v913_v26 = vadd.f32 %v1547_v28, %v833_v40  ;;  %v917_v29 = vadd.f32 %v1573_v45, %v837_v41  ;;  %v921_v18 = vadd.f32 %v1575_v46, %v841_v43 }
 0x151   : > { %925 = vst [vmem:[%s1567_s21] sm:$0xff] %v893_v51  ;;  %929 = vst [vmem:[%s1567_s21 + $0x20] sm:$0xff] %v897_v38  ;;  %v735_v1 = vmul.f32 %v1072_v15, %v1395_v14  ;;  %v739_v2 = vmul.f32 %v1072_v15, %v1398_v32  ;;  %v743_v31 = vmul.f32 %v1072_v15, %v1401_v50 }
 0x152   : > { %933 = vst [vmem:[%s1567_s21 + $0x40] sm:$0xff] %v901_v23  ;;  %937 = vst [vmem:[%s1567_s21 + $0x60] sm:$0xff] %v905_v48  ;;  %v747_v57 = vmul.f32 %v1072_v15, %v1404_v52  ;;  %v751_v6 = vmul.f32 %v1072_v15, %v1407_v53  ;;  %v755_v8 = vmul.f32 %v1072_v15, %v1410_v54 }
 0x153   : > { %941 = vst [vmem:[%s1567_s21 + $0x80] sm:$0xff] %v909_v0  ;;  %945 = vst [vmem:[%s1567_s21 + $0xa0] sm:$0xff] %v913_v26  ;;  %v759_v21 = vmul.f32 %v1072_v15, %v1413_v55  ;;  %v763_v47 = vmul.f32 %v1072_v15, %v1415_v56  ;;  %v815_v14 = vmul.f32 %v1421_v34, %v735_v1  ;;  %v1074_v30 = vpop.eup %1073 }
 0x154   : > { %949 = vst [vmem:[%s1567_s21 + $0xc0] sm:$0xff] %v917_v29  ;;  %953 = vst [vmem:[%s1567_s21 + $0xe0] sm:$0xff] %v921_v18  ;;  %v819_v32 = vmul.f32 %v1423_v58, %v739_v2  ;;  %v823_v50 = vmul.f32 %v1465_v27, %v743_v31  ;;  %v827_v52 = vmul.f32 %v1467_v19, %v747_v57 }
 0x155   : > { %v831_v53 = vmul.f32 %v1501_v11, %v751_v6  ;;  %v835_v54 = vmul.f32 %v1503_v35, %v755_v8  ;;  %v839_v55 = vmul.f32 %v1523_v44, %v759_v21  ;;  %v843_v56 = vmul.f32 %v1525_v49, %v763_v47 }
 0x156   : > { %v895_v33 = vadd.f32 %v1533_v39, %v815_v14  ;;  %v899_v15 = vadd.f32 %v1535_v24, %v819_v32  ;;  %v903_v36 = vadd.f32 %v1541_v63, %v823_v50  ;;  %v907_v40 = vadd.f32 %v1543_v12, %v827_v52 }
 0x157   : > { %v911_v41 = vadd.f32 %v1545_v61, %v831_v53  ;;  %v915_v43 = vadd.f32 %v1547_v28, %v835_v54  ;;  %v919_v51 = vadd.f32 %v1573_v45, %v839_v55  ;;  %v923_v38 = vadd.f32 %v1575_v46, %v843_v56 }
 0x158   : > { %927 = vst [vmem:[%s1567_s21 + $0x10] sm:$0xff] %v895_v33  ;;  %931 = vst [vmem:[%s1567_s21 + $0x30] sm:$0xff] %v899_v15  ;;  %v734_v23 = vmul.f32 %v1074_v30, %v1434_v3  ;;  %v738_v48 = vmul.f32 %v1074_v30, %v1437_v4  ;;  %v742_v0 = vmul.f32 %v1074_v30, %v1440_v5  ;;  %v719_v50 = vrot.slane %v1549_v42, 1 }
 0x159   : > { %935 = vst [vmem:[%s1567_s21 + $0x50] sm:$0xff] %v903_v36  ;;  %939 = vst [vmem:[%s1567_s21 + $0x70] sm:$0xff] %v907_v40  ;;  %v746_v26 = vmul.f32 %v1074_v30, %v1443_v10  ;;  %v750_v29 = vmul.f32 %v1074_v30, %v1446_v16  ;;  %v754_v18 = vmul.f32 %v1074_v30, %v1449_v20 }
 0x15a   : > { %943 = vst [vmem:[%s1567_s21 + $0x90] sm:$0xff] %v911_v41  ;;  %947 = vst [vmem:[%s1567_s21 + $0xb0] sm:$0xff] %v915_v43  ;;  %v758_v1 = vmul.f32 %v1074_v30, %v1452_v7  ;;  %v762_v2 = vmul.f32 %v1074_v30, %v1455_v9  ;;  %v814_v3 = vmul.f32 %v1421_v34, %v734_v23 }
 0x15b   : > { %951 = vst [vmem:[%s1567_s21 + $0xd0] sm:$0xff] %v919_v51  ;;  %955 = vst [vmem:[%s1567_s21 + $0xf0] sm:$0xff] %v923_v38  ;;  %v818_v4 = vmul.f32 %v1423_v58, %v738_v48  ;;  %v822_v5 = vmul.f32 %v1465_v27, %v742_v0  ;;  %v826_v10 = vmul.f32 %v1467_v19, %v746_v26 }
 0x15c   : > { %v830_v16 = vmul.f32 %v1501_v11, %v750_v29  ;;  %v834_v20 = vmul.f32 %v1503_v35, %v754_v18  ;;  %v838_v7 = vmul.f32 %v1523_v44, %v758_v1  ;;  %v842_v9 = vmul.f32 %v1525_v49, %v762_v2 }
 0x15d   : > { %v894_v31 = vadd.f32 %v1533_v39, %v814_v3  ;;  %v898_v57 = vadd.f32 %v1535_v24, %v818_v4  ;;  %v902_v6 = vadd.f32 %v1541_v63, %v822_v5  ;;  %v906_v8 = vadd.f32 %v1543_v12, %v826_v10 }
 0x15e   : > { %v910_v21 = vadd.f32 %v1545_v61, %v830_v16  ;;  %v914_v47 = vadd.f32 %v1547_v28, %v834_v20  ;;  %v918_v14 = vadd.f32 %v1573_v45, %v838_v7  ;;  %v922_v32 = vadd.f32 %v1575_v46, %v842_v9 }
 0x15f   : > { %926 = vst [vmem:[%s1567_s21 + $0x8] sm:$0xff] %v894_v31  ;;  %930 = vst [vmem:[%s1567_s21 + $0x28] sm:$0xff] %v898_v57  ;;  %v720_v52 = vadd.f32 %v719_v50, %v1549_v42 }
 0x160   : > { %934 = vst [vmem:[%s1567_s21 + $0x48] sm:$0xff] %v902_v6  ;;  %938 = vst [vmem:[%s1567_s21 + $0x68] sm:$0xff] %v906_v8 }
 0x161   : > { %942 = vst [vmem:[%s1567_s21 + $0x88] sm:$0xff] %v910_v21  ;;  %946 = vst [vmem:[%s1567_s21 + $0xa8] sm:$0xff] %v914_v47  ;;  %v724_v30 = vmul.f32 0.015625, %v720_v52 }
 0x162   : > { %950 = vst [vmem:[%s1567_s21 + $0xc8] sm:$0xff] %v918_v14  ;;  %954 = vst [vmem:[%s1567_s21 + $0xe8] sm:$0xff] %v922_v32 }
 0x163   : > { %v728_v53 = vadd.f32 1e-05, %v724_v30 }
 0x165   : > { %1075 = vrsqrt.f32 %v728_v53 }
 0x16f   : > { %v1076_v54 = vpop.eup %1075 }
 0x170   : > { %v736_v55 = vmul.f32 %v1076_v54, %v1484_v60  ;;  %v740_v56 = vmul.f32 %v1076_v54, %v1487_v17  ;;  %v744_v33 = vmul.f32 %v1076_v54, %v1490_v59  ;;  %v748_v15 = vmul.f32 %v1076_v54, %v1493_v37 }
 0x171   : > { %v752_v36 = vmul.f32 %v1076_v54, %v1496_v62  ;;  %v756_v40 = vmul.f32 %v1076_v54, %v1499_v22  ;;  %v760_v41 = vmul.f32 %v1076_v54, %v1506_v13  ;;  %v764_v42 = vmul.f32 %v1076_v54, %v1509_v25 }
 0x172   : > { %v816_v43 = vmul.f32 %v1421_v34, %v736_v55  ;;  %v820_v51 = vmul.f32 %v1423_v58, %v740_v56  ;;  %v824_v60 = vmul.f32 %v1465_v27, %v744_v33  ;;  %v828_v17 = vmul.f32 %v1467_v19, %v748_v15 }
 0x173   : > { %v832_v59 = vmul.f32 %v1501_v11, %v752_v36  ;;  %v836_v37 = vmul.f32 %v1503_v35, %v756_v40  ;;  %v840_v62 = vmul.f32 %v1523_v44, %v760_v41  ;;  %v844_v34 = vmul.f32 %v1525_v49, %v764_v42 }
 0x174   : > { %v896_v58 = vadd.f32 %v1533_v39, %v816_v43  ;;  %v900_v27 = vadd.f32 %v1535_v24, %v820_v51  ;;  %v904_v22 = vadd.f32 %v1541_v63, %v824_v60  ;;  %v908_v19 = vadd.f32 %v1543_v12, %v828_v17 }
 0x175   : > { %v912_v11 = vadd.f32 %v1545_v61, %v832_v59  ;;  %v916_v13 = vadd.f32 %v1547_v28, %v836_v37  ;;  %v920_v35 = vadd.f32 %v1573_v45, %v840_v62  ;;  %v924_v25 = vadd.f32 %v1575_v46, %v844_v34 }
 0x176   : > { %928 = vst [vmem:[%s1567_s21 + $0x18] sm:$0xff] %v896_v58  ;;  %932 = vst [vmem:[%s1567_s21 + $0x38] sm:$0xff] %v900_v27 }
 0x177   : > { %936 = vst [vmem:[%s1567_s21 + $0x58] sm:$0xff] %v904_v22  ;;  %940 = vst [vmem:[%s1567_s21 + $0x78] sm:$0xff] %v908_v19 }
 0x178   : > { %944 = vst [vmem:[%s1567_s21 + $0x98] sm:$0xff] %v912_v11  ;;  %948 = vst [vmem:[%s1567_s21 + $0xb8] sm:$0xff] %v916_v13 }
 0x179   : > { %952 = vst [vmem:[%s1567_s21 + $0xd8] sm:$0xff] %v920_v35  ;;  %956 = vst [vmem:[%s1567_s21 + $0xf8] sm:$0xff] %v924_v25 }
 0x17a PF: > { %s15_s18 = sadd.s32 1, %s1083_s18  }
 0x17b   : > { %p12_p4 = scmp.ge.s32.totalorder %s15_s18, 4  }
 0x17d   :  { %14 = sbr.rel (!%p12_p4) target bundleno = 1 (0x1), region = 70 }

</bundles_post_ra>
